<compile_context>
chip_gen: v5e
topology: v5e:2x2
jax: 0.10.0
libtpu: 0.0.40
codegen_flags: <defaults>
</compile_context>

<pallas_src>
import jax
import jax.numpy as jnp
from jax import lax
from jax.experimental import pallas as pl
from jax.experimental.pallas import tpu as pltpu

LANES = 128
SUBLANES = 8
MAX_TILE_ROWS = 4096   # 4096*128*4B = 2 MiB per f32 buffer; 8 MiB total double-buffered


def _cdiv(a: int, b: int) -> int:
    return -(-a // b)


def _round_up(a: int, b: int) -> int:
    return _cdiv(a, b) * b


def _focal_kernel(gamma: float, tile_rows: int, steps: int, boundary_valid):
    """Kernel closure. boundary_valid = # valid elements in the last tile, or None if
    every element of every tile is valid (no masking needed anywhere)."""
    g = float(gamma)

    def reduce_to_block(v):
        # (tile_rows,128) -> (tile_rows//8, 8, 128) -> sum over axis 0: pure VPU adds,
        # result is a vreg-aligned (8,128) partial sum.
        return v.reshape(tile_rows // SUBLANES, SUBLANES, LANES).sum(axis=0)

    def kernel(x_ref, y_ref, out_ref):
        i = pl.program_id(0)

        @pl.when(i == 0)
        def _init():
            out_ref[...] = jnp.zeros_like(out_ref)

        x = x_ref[...].astype(jnp.float32)
        y = y_ref[...].astype(jnp.float32)

        # Stable BCE-with-logits (identical to the PyTorch max_val formulation).
        bce = jnp.maximum(x, 0.0) - x * y + jnp.log1p(jnp.exp(-jnp.abs(x)))

        # Focal modulation: exp(gamma * logsigmoid(z)) with a stable logsigmoid.
        z = -x * (2.0 * y - 1.0)
        logsig = jnp.minimum(z, 0.0) - jnp.log1p(jnp.exp(-jnp.abs(z)))
        focal = jnp.exp(g * logsig) * bce          # (tile_rows, 128)

        if boundary_valid is None:
            out_ref[...] += reduce_to_block(focal)
        else:
            last = steps - 1

            @pl.when(i != last)
            def _hot():                            # no mask math on the hot path
                out_ref[...] += reduce_to_block(focal)

            @pl.when(i == last)
            def _edge():
                # Only this tile can contain partial-edge-block garbage rows and/or
                # explicit zero padding; mask by within-tile flat index (fits int32:
                # tile_rows*128 <= 524288, so no 2^31-element ceiling anymore).
                r = lax.broadcasted_iota(jnp.int32, (tile_rows, LANES), 0)
                c = lax.broadcasted_iota(jnp.int32, (tile_rows, LANES), 1)
                valid = (r * LANES + c) < boundary_valid
                out_ref[...] += reduce_to_block(jnp.where(valid, focal, 0.0))

    return kernel


def focal_loss(logit: jax.Array, target: jax.Array, gamma: float = 2.0) -> jax.Array:
    """FocalLoss.forward(logit, target)."""
    assert logit.shape == target.shape
    total = int(logit.size)
    # PyTorch: loss.sum(dim=1).mean() for 2-D loss, plain mean otherwise.
    divisor = float(logit.shape[0]) if logit.ndim == 2 else float(total)

    xf = logit.reshape(-1)   # free reshapes (bitcast); no dtype cast in the wrapper
    yf = target.reshape(-1)

    rows = _cdiv(total, LANES)

    # Sublane packing multiple: 8 rows/vreg for 32-bit, 16 for 16-bit, 32 for 8-bit.
    itemsize = min(logit.dtype.itemsize, target.dtype.itemsize)
    row_mult = SUBLANES * max(1, 4 // max(1, itemsize))

    if rows <= MAX_TILE_ROWS:
        # Tiny input: a single tile; round rows up so the block is vreg-aligned.
        tile_rows = _round_up(max(rows, 1), row_mult)
        padded_rows = tile_rows
    else:
        # Large input: fixed-size tiles; ragged row tail becomes a Pallas partial edge
        # block (no physical padding, garbage rows masked on the boundary tile only).
        tile_rows = MAX_TILE_ROWS
        padded_rows = rows

    pad = padded_rows * LANES - total
    if pad:
        # Only when total isn't lane-aligned (<=127 elems) or the input is single-tile
        # sized; the common large lane-aligned case pays no copy at all.
        xf = jnp.pad(xf, (0, pad))
        yf = jnp.pad(yf, (0, pad))
    x2d = xf.reshape(padded_rows, LANES)
    y2d = yf.reshape(padded_rows, LANES)

    steps = _cdiv(padded_rows, tile_rows)
    boundary_valid = total - (steps - 1) * tile_rows * LANES
    if boundary_valid == tile_rows * LANES:
        boundary_valid = None   # every tile fully valid -> masking compiled out

    partials = pl.pallas_call(
        _focal_kernel(gamma, tile_rows, steps, boundary_valid),
        out_shape=jax.ShapeDtypeStruct((SUBLANES, LANES), jnp.float32),
        grid_spec=pltpu.PrefetchScalarGridSpec(
            num_scalar_prefetch=0,
            grid=(steps,),
            in_specs=[
                pl.BlockSpec((tile_rows, LANES), lambda i: (i, 0)),
                pl.BlockSpec((tile_rows, LANES), lambda i: (i, 0)),
            ],
            out_specs=pl.BlockSpec((SUBLANES, LANES), lambda i: (0, 0)),
        ),
        compiler_params=pltpu.CompilerParams(
            dimension_semantics=("arbitrary",),
        ),
    )(x2d, y2d)

    # Tiny XLA epilogue: fold the lane-dense (8,128) partial sums and normalize.
    return jnp.sum(partials) / jnp.float32(divisor)


def _reference(logit, target, gamma=2.0):
    """Pure-JAX mirror of the PyTorch forward."""
    x = logit.astype(jnp.float32)
    y = target.astype(jnp.float32)
    max_val = jnp.maximum(-x, 0.0)
    loss = x - x * y + max_val + jnp.log(jnp.exp(-max_val) + jnp.exp(-x - max_val))
    invprobs = jax.nn.log_sigmoid(-x * (y * 2.0 - 1.0))
    loss = jnp.exp(invprobs * gamma) * loss
    if loss.ndim == 2:
        loss = loss.sum(axis=1)
    return loss.mean()


if __name__ == "__main__":
    key = jax.random.PRNGKey(0)
    k1, k2, k3, k4 = jax.random.split(key, 4)

    # Test 1: 4-D segmentation-style logits (plain-mean branch), binary targets.
    # total = 2048 is lane-aligned -> fully copy-free path, no masking compiled in.
    B, C, H, W = 2, 4, 16, 16
    logit4 = jax.random.normal(k1, (B, C, H, W), dtype=jnp.float32)
    target4 = (jax.random.uniform(k2, (B, C, H, W)) > 0.5).astype(jnp.float32)
    loss4 = focal_loss(logit4, target4, gamma=2.0)
    jax.block_until_ready(loss4)
    ref4 = _reference(logit4, target4, gamma=2.0)
    assert jnp.allclose(loss4, ref4, rtol=1e-5, atol=1e-6), (loss4, ref4)

    # Test 2: 2-D logits (sum(dim=1).mean() branch), soft targets; 148 elements is
    # ragged -> exercises the minimal lane pad + boundary-tile mask path.
    logit2 = jax.random.normal(k3, (4, 37), dtype=jnp.float32)
    target2 = jax.random.uniform(k4, (4, 37), dtype=jnp.float32)
    loss2 = focal_loss(logit2, target2, gamma=2.0)
    jax.block_until_ready(loss2)
    ref2 = _reference(logit2, target2, gamma=2.0)
    assert jnp.allclose(loss2, ref2, rtol=1e-5, atol=1e-6), (loss2, ref2)

    # Test 3: bf16 logits (packed sublane path: tile rows rounded to a multiple of 16).
    logit3 = jax.random.normal(k1, (B, C, H, W), dtype=jnp.bfloat16)
    loss3 = focal_loss(logit3, target4, gamma=2.0)
    jax.block_until_ready(loss3)
    ref3 = _reference(logit3, target4, gamma=2.0)
    assert jnp.allclose(loss3, ref3, rtol=1e-5, atol=1e-6), (loss3, ref3)

    print("KERNEL_OK")
</pallas_src>

<mosaic_0001>
module attributes {stable_mosaic.version = 11 : i64} {
  func.func @kernel(%arg0: i32, %arg1: memref<16x128xf32, #tpu.memory_space<vmem>>, %arg2: memref<16x128xf32, #tpu.memory_space<vmem>>, %arg3: memref<8x128xf32, #tpu.memory_space<vmem>>) attributes {dimension_semantics = [#tpu.dimension_semantics<arbitrary>], iteration_bounds = array<i64: 1>, scalar_prefetch = 0 : i64, scratch_operands = 0 : i64, tpu.core_type = #tpu.core_type<tc>, window_params = [{transform_indices = @transform_0, window_bounds = array<i64: 16, 128>}, {transform_indices = @transform_1, window_bounds = array<i64: 16, 128>}, {pipeline_mode = #tpu.pipeline_mode<synchronous>, transform_indices = @transform_2, window_bounds = array<i64: 8, 128>}]} {
    %c0_i32 = arith.constant 0 : i32
    %0 = arith.cmpi eq, %arg0, %c0_i32 : i32
    %1 = arith.extui %0 : i1 to i32
    %c0_i32_0 = arith.constant 0 : i32
    %2 = arith.cmpi ne, %1, %c0_i32_0 : i32
    scf.if %2 {
      %cst_16 = arith.constant 0.000000e+00 : f32
      %39 = vector.broadcast %cst_16 : f32 to vector<8x128xf32>
      %c0_17 = arith.constant 0 : index
      %c0_18 = arith.constant 0 : index
      %40 = vector.load %arg3[%c0_17, %c0_18] : memref<8x128xf32, #tpu.memory_space<vmem>>, vector<8x128xf32>
      tpu.vector_store %arg3[%c0_17, %c0_18], %39 {strides = array<i32>} : memref<8x128xf32, #tpu.memory_space<vmem>>, vector<8x128xf32>,
    } else {
    }
    %c0 = arith.constant 0 : index
    %c0_1 = arith.constant 0 : index
    %3 = vector.load %arg1[%c0, %c0_1] : memref<16x128xf32, #tpu.memory_space<vmem>>, vector<16x128xf32>
    %c0_2 = arith.constant 0 : index
    %c0_3 = arith.constant 0 : index
    %4 = vector.load %arg2[%c0_2, %c0_3] : memref<16x128xf32, #tpu.memory_space<vmem>>, vector<16x128xf32>
    %cst = arith.constant 0.000000e+00 : f32
    %5 = vector.broadcast %cst : f32 to vector<16x128xf32>
    %6 = arith.maximumf %3, %5 : vector<16x128xf32>
    %7 = arith.mulf %3, %4 : vector<16x128xf32>
    %8 = arith.subf %6, %7 : vector<16x128xf32>
    %9 = math.absf %3 : vector<16x128xf32>
    %cst_4 = arith.constant 0.000000e+00 : f32
    %10 = vector.broadcast %cst_4 : f32 to vector<16x128xf32>
    %11 = arith.subf %10, %9 : vector<16x128xf32>
    %12 = math.exp %11 : vector<16x128xf32>
    %13 = math.log1p %12 : vector<16x128xf32>
    %14 = arith.addf %8, %13 : vector<16x128xf32>
    %cst_5 = arith.constant 0.000000e+00 : f32
    %15 = vector.broadcast %cst_5 : f32 to vector<16x128xf32>
    %16 = arith.subf %15, %3 : vector<16x128xf32>
    %cst_6 = arith.constant 2.000000e+00 : f32
    %17 = vector.broadcast %cst_6 : f32 to vector<16x128xf32>
    %18 = arith.mulf %17, %4 : vector<16x128xf32>
    %cst_7 = arith.constant 1.000000e+00 : f32
    %19 = vector.broadcast %cst_7 : f32 to vector<16x128xf32>
    %20 = arith.subf %18, %19 : vector<16x128xf32>
    %21 = arith.mulf %16, %20 : vector<16x128xf32>
    %cst_8 = arith.constant 0.000000e+00 : f32
    %22 = vector.broadcast %cst_8 : f32 to vector<16x128xf32>
    %23 = arith.minimumf %21, %22 : vector<16x128xf32>
    %24 = math.absf %21 : vector<16x128xf32>
    %cst_9 = arith.constant 0.000000e+00 : f32
    %25 = vector.broadcast %cst_9 : f32 to vector<16x128xf32>
    %26 = arith.subf %25, %24 : vector<16x128xf32>
    %27 = math.exp %26 : vector<16x128xf32>
    %28 = math.log1p %27 : vector<16x128xf32>
    %29 = arith.subf %23, %28 : vector<16x128xf32>
    %cst_10 = arith.constant 2.000000e+00 : f32
    %30 = vector.broadcast %cst_10 : f32 to vector<16x128xf32>
    %31 = arith.mulf %30, %29 : vector<16x128xf32>
    %32 = math.exp %31 : vector<16x128xf32>
    %33 = arith.mulf %32, %14 : vector<16x128xf32>
    %c0_11 = arith.constant 0 : index
    %c0_12 = arith.constant 0 : index
    %34 = vector.load %arg3[%c0_11, %c0_12] : memref<8x128xf32, #tpu.memory_space<vmem>>, vector<8x128xf32>
    %35 = vector.shape_cast %33 : vector<16x128xf32> to vector<2x8x128xf32>
    %cst_13 = arith.constant dense<0.000000e+00> : vector<8x128xf32>
    %36 = vector.multi_reduction <add>, %35, %cst_13 [0] : vector<2x8x128xf32> to vector<8x128xf32>
    %37 = arith.addf %34, %36 : vector<8x128xf32>
    %c0_14 = arith.constant 0 : index
    %c0_15 = arith.constant 0 : index
    %38 = vector.load %arg3[%c0_14, %c0_15] : memref<8x128xf32, #tpu.memory_space<vmem>>, vector<8x128xf32>
    tpu.vector_store %arg3[%c0_14, %c0_15], %37 {strides = array<i32>} : memref<8x128xf32, #tpu.memory_space<vmem>>, vector<8x128xf32>,
    return
  }
  func.func @transform_0(%arg0: i32) -> (i32, i32) {
    %c0_i32 = arith.constant 0 : i32
    %c0_i32_0 = arith.constant 0 : i32
    return %arg0, %c0_i32 : i32, i32
  }
  func.func @transform_1(%arg0: i32) -> (i32, i32) {
    %c0_i32 = arith.constant 0 : i32
    %c0_i32_0 = arith.constant 0 : i32
    return %arg0, %c0_i32 : i32, i32
  }
  func.func @transform_2(%arg0: i32) -> (i32, i32) {
    %c0_i32 = arith.constant 0 : i32
    %c0_i32_0 = arith.constant 0 : i32
    %c0_i32_1 = arith.constant 0 : i32
    return %c0_i32, %c0_i32_0 : i32, i32
  }
}

</mosaic_0001>

<bundles_post_ra>
// kernel: tpu_custom_call.1
= control target key start
LH: loop header
LB: loop body
LE: loop exit
PB: predicated region body
PF: predicated region fallthrough
CT: control target
= control target key end

     0   :  { %7 = vsyncpa [#allocation3], 0  ;;  %s310_s0 = inlined_call_operand.hbm [shape: f32[16,128], index: 0, kind: input, shape index: {}]   ;;  %s311_s1 = inlined_call_operand.hbm [shape: f32[16,128], index: 1, kind: input, shape index: {}]   ;;  %s312_s2 = inlined_call_operand.hbm [shape: f32[8,128], index: 2, kind: output, shape index: {}]  }
   0x1   :  { %8 = vsyncpa [#allocation6], 0 }
   0x2   :  { %9 = vsyncpa [#allocation4], 0  ;;  %s14_s11 = sshll.u32 %s310_s0, 4  ;;  %s261_s12 = smov [#allocation2]   ;;  %s15_s11 = int_to_ptr.hbm [resolvable:$true] %s14_s11 }
   0x3   :  { %s16_s13 = sshll.u32 %s261_s12, 4  ;;  %s27_s16 = sshll.u32 %s311_s1, 4  ;;  %s17_s13 = int_to_ptr.vmem [resolvable:$true] %s16_s13  ;;  %s28_s16 = int_to_ptr.hbm [resolvable:$true] %s27_s16 }
   0x4   :  { %s262_s17 = smov 128   ;;  %s263_s18 = smov 8  }
   0x5   :  { %22 = dma.hbm_to_vmem [thread:$0]  %s15_s11, 256, %s17_s13, [#allocation3], %s262_s17, %s262_s17, %s263_s18  }
   0x6   :  { %s264_s19 = smov [#allocation5]  }
   0x7   :  { %s29_s20 = sshll.u32 %s264_s19, 4  ;;  %s30_s20 = int_to_ptr.vmem [resolvable:$true] %s29_s20 }
   0x8   :  { %35 = dma.hbm_to_vmem [thread:$0]  %s28_s16, 256, %s30_s20, [#allocation6], %s262_s17, %s262_s17, %s263_s18  }
   0x9   :  { %255 = dma.done.wait [#allocation3], 256  }
   0xa   :  { %256 = vsyncadd [#allocation3], 4294967040 }
   0xb   :  { %257 = dma.done.wait [#allocation6], 256  }
   0xc   :  { %258 = vsyncadd [#allocation6], 4294967040  ;;  %v287_v0 = vld [vmem:[#allocation2] sm:$0xff]  ;;  %v289_v1 = vld [vmem:[#allocation2 + $0x8] sm:$0xff]  ;;  %s265_s0 = smov [#allocation7]   ;;  %s144_s23 = sshll.u32 %s312_s2, 4  ;;  %s145_s23 = int_to_ptr.hbm [resolvable:$true] %s144_s23 }
   0xd   :  { %v291_v2 = vld [vmem:[#allocation5] sm:$0xff]  ;;  %v293_v3 = vld [vmem:[#allocation5 + $0x8] sm:$0xff]  ;;  %v59_v4 = vand.u32 2147483647, %v287_v0  ;;  %v87_v5 = vsub.f32 0.0, %v287_v0  ;;  %v88_v6 = vsub.f32 0.0, %v289_v1 }
   0xe   :  { %v89_v7 = vmul.f32 2.0, %v291_v2  ;;  %v90_v8 = vmul.f32 2.0, %v293_v3  ;;  %v60_v9 = vand.u32 2147483647, %v289_v1  ;;  %v53_v53 = vmax.f32 %v287_v0, 0.0  ;;  %s142_s1 = sshll.u32 %s265_s0, 4  ;;  %s143_s1 = int_to_ptr.vmem [resolvable:$true] %s142_s1 }
   0xf   :  { %v61_v12 = vsub.f32 0.0, %v59_v4  ;;  %v55_v56 = vmul.f32 %v291_v2, %v287_v0  ;;  %v54_v63 = vmax.f32 %v289_v1, 0.0  ;;  %v56_v4 = vmul.f32 %v293_v3, %v289_v1 }
  0x10   :  { %v155_v10 = vadd.f32 -1.0, %v89_v7  ;;  %v156_v11 = vadd.f32 -1.0, %v90_v8  ;;  %v62_v15 = vsub.f32 0.0, %v60_v9 }
  0x11   :  { %v63_v18 = vmul.f32 1.442695, %v61_v12  ;;  %v57_v9 = vsub.f32 %v53_v53, %v55_v56 }
  0x12   :  { %v93_v13 = vmul.f32 %v155_v10, %v87_v5  ;;  %v94_v14 = vmul.f32 %v156_v11, %v88_v6  ;;  %v65_v21 = vmul.f32 1.442695, %v62_v15  ;;  %v58_v10 = vsub.f32 %v54_v63, %v56_v4 }
  0x13   :  { %163 = vpow2.f32 %v63_v18 }
  0x14   :  { %v97_v16 = vand.u32 2147483647, %v93_v13  ;;  %v98_v17 = vand.u32 2147483647, %v94_v14  ;;  %v95_v41 = vmin.f32 %v93_v13, 0.0  ;;  %v96_v47 = vmin.f32 %v94_v14, 0.0 }
  0x16   :  { %v99_v19 = vsub.f32 0.0, %v97_v16  ;;  %v100_v20 = vsub.f32 0.0, %v98_v17 }
  0x18   :  { %v101_v22 = vmul.f32 1.442695, %v99_v19  ;;  %v103_v23 = vmul.f32 1.442695, %v100_v20 }
  0x19   :  { %v164_v24 = vpop.eup %163 }
  0x1a   :  { %165 = vpow2.f32 %v101_v22  ;;  %v67_v30 = vadd.f32 1.0, %v164_v24  ;;  %v70_v37 = vmul.f32 -0.5, %v164_v24  ;;  %v73_v50 = vand.u32 2147483647, %v164_v24 }
  0x1b   :  { %167 = vpow2.f32 %v65_v21 }
  0x1c   :  { %169 = vpow2.f32 %v103_v23  ;;  %v71_v46 = vadd.f32 1.0, %v70_v37  ;;  %vm74_vm2 = vcmp.lt.f32.partialorder %v73_v50, 0.0004427343 }
  0x1e   :  { %v72_v61 = vmul.f32 %v164_v24, %v71_v46 }
  0x20   :  { %v166_v25 = vpop.eup %165 }
  0x21   :  { %v105_v26 = vadd.f32 1.0, %v166_v25  ;;  %v108_v27 = vmul.f32 -0.5, %v166_v25  ;;  %v168_v28 = vpop.eup %167  ;;  %v111_v35 = vand.u32 2147483647, %v166_v25 }
  0x22   :  { %v170_v29 = vpop.eup %169  ;;  %v76_v34 = vadd.f32 1.0, %v168_v28  ;;  %v79_v42 = vmul.f32 -0.5, %v168_v28  ;;  %v82_v57 = vand.u32 2147483647, %v168_v28 }
  0x23   :  { %171 = vlog2.f32 %v105_v26  ;;  %v109_v31 = vadd.f32 1.0, %v108_v27  ;;  %v114_v32 = vadd.f32 1.0, %v170_v29  ;;  %v117_v33 = vmul.f32 -0.5, %v170_v29 }
  0x24   :  { %v120_v39 = vand.u32 2147483647, %v170_v29  ;;  %vm112_vm0 = vcmp.lt.f32.partialorder %v111_v35, 0.0004427343  ;;  %v80_v54 = vadd.f32 1.0, %v79_v42 }
  0x25   :  { %173 = vlog2.f32 %v114_v32  ;;  %v118_v36 = vadd.f32 1.0, %v117_v33  ;;  %v110_v38 = vmul.f32 %v166_v25, %v109_v31  ;;  %vm83_vm3 = vcmp.lt.f32.partialorder %v82_v57, 0.0004427343 }
  0x26   :  { %175 = vlog2.f32 %v67_v30  ;;  %vm121_vm1 = vcmp.lt.f32.partialorder %v120_v39, 0.0004427343  ;;  %v81_v7 = vmul.f32 %v168_v28, %v80_v54 }
  0x27   :  { %177 = vlog2.f32 %v76_v34  ;;  %v119_v44 = vmul.f32 %v170_v29, %v118_v36 }
  0x29   :  { %v172_v40 = vpop.eup %171 }
  0x2a   :  { %v107_v43 = vmul.f32 0.6931472, %v172_v40 }
  0x2b   :  { %v174_v45 = vpop.eup %173 }
  0x2c   :  { %v113_v48 = vsel %vm112_vm0, %v110_v38, %v107_v43  ;;  %v176_v49 = vpop.eup %175  ;;  %v116_v51 = vmul.f32 0.6931472, %v174_v45 }
  0x2d   :  { %v123_v52 = vsub.f32 %v95_v41, %v113_v48  ;;  %v178_v55 = vpop.eup %177  ;;  %v69_v60 = vmul.f32 0.6931472, %v176_v49 }
  0x2e   :  { %v122_v58 = vsel %vm121_vm1, %v119_v44, %v116_v51  ;;  %v78_v6 = vmul.f32 0.6931472, %v178_v55 }
  0x2f   :  { %v125_v59 = vmul.f32 2.0, %v123_v52  ;;  %v124_v62 = vsub.f32 %v96_v47, %v122_v58  ;;  %v75_v0 = vsel %vm74_vm2, %v72_v61, %v69_v60 }
  0x30   :  { %v84_v11 = vsel %vm83_vm3, %v81_v7, %v78_v6  ;;  %v85_v12 = vadd.f32 %v75_v0, %v57_v9 }
  0x31   :  { %v127_v5 = vmul.f32 1.442695, %v125_v59  ;;  %v126_v8 = vmul.f32 2.0, %v124_v62  ;;  %v86_v14 = vadd.f32 %v84_v11, %v58_v10 }
  0x33   :  { %179 = vpow2.f32 %v127_v5  ;;  %v129_v2 = vmul.f32 1.442695, %v126_v8 }
  0x35   :  { %181 = vpow2.f32 %v129_v2 }
  0x39   :  { %v180_v13 = vpop.eup %179 }
  0x3a   :  { %v131_v15 = vmul.f32 %v180_v13, %v85_v12 }
  0x3b   :  { %v182_v16 = vpop.eup %181 }
  0x3c   :  { %v132_v17 = vmul.f32 %v182_v16, %v86_v14 }
  0x3e   :  { %v134_v1 = vadd.f32 %v132_v17, %v131_v15 }
  0x40   :  { %136 = vst [vmem:[#allocation7] sm:$0xff] %v134_v1 }
  0x41   :  { %147 = dma.vmem_to_hbm [thread:$0]  %s143_s1, 128, %s145_s23, [#allocation4]  }
  0x42   :  { %259 = dma.done.wait [#allocation4], 128  }
  0x43   :  { %260 = vsyncadd [#allocation4], 4294967168 }
  0x44   :  { %152 = vsyncpa [#allocation3], 1 }
  0x45   :  { %153 = vsyncpa [#allocation6], 1 }
  0x46   :  { %154 = vsyncpa [#allocation4], 1 }

</bundles_post_ra>
